<compile_context>
chip_gen: v5e
topology: v5e:2x2
jax: 0.10.0
libtpu: 0.0.40
codegen_flags: <defaults>
</compile_context>

<pallas_src>
import jax
import jax.numpy as jnp
from jax.experimental import pallas as pl
from jax.experimental.pallas import tpu as pltpu


def _round_up(x, m):
    return (x + m - 1) // m * m


def _ppo_actor_kernel(ob_ref, w1_ref, b1_ref, w2_ref, b2_ref, w3_ref, b3_ref,
                      out_ref):
    x = ob_ref[...]                       # (TB, size_ob), compute dtype
    cdt = x.dtype

    # act_out = relu(act_inp(ob_f)); f32 accumulation on the MXU.
    h1 = jnp.dot(x, w1_ref[...], preferred_element_type=jnp.float32) + b1_ref[...]
    h1 = jnp.maximum(h1, 0.0).astype(cdt)

    # act_out = relu(act_int(act_out))
    h2 = jnp.dot(h1, w2_ref[...], preferred_element_type=jnp.float32) + b2_ref[...]
    h2 = jnp.maximum(h2, 0.0).astype(cdt)

    # act_out = softmax(act_out(act_out), dim=-1) over the real action lanes only.
    logits = jnp.dot(h2, w3_ref[...], preferred_element_type=jnp.float32) + b3_ref[...]
    m = jnp.max(logits, axis=-1, keepdims=True)
    e = jnp.exp(logits - m)
    denom = jnp.sum(e, axis=-1, keepdims=True)
    out_ref[...] = (e / denom).astype(out_ref.dtype)   # exact divide: rows sum to 1


def init_params(key, size_ob, hidden1, hidden2, size_action):
    """PyTorch-style (Kaiming-uniform-ish) init; weights stored as (in, out)."""
    def linear(key, fan_in, fan_out):
        kw, kb = jax.random.split(key)
        bound = 1.0 / jnp.sqrt(fan_in)
        w = jax.random.uniform(kw, (fan_in, fan_out), jnp.float32, -bound, bound)
        b = jax.random.uniform(kb, (1, fan_out), jnp.float32, -bound, bound)
        return w, b

    k1, k2, k3 = jax.random.split(key, 3)
    w1, b1 = linear(k1, size_ob, hidden1)
    w2, b2 = linear(k2, hidden1, hidden2)
    w3, b3 = linear(k3, hidden2, size_action)
    return {"w1": w1, "b1": b1, "w2": w2, "b2": b2, "w3": w3, "b3": b3}


def prepare_params(raw, compute_dtype=jnp.bfloat16):
    """One-time prep.

    Only the HIDDEN dims are zero-padded up to a 128-lane multiple (exact:
    ReLU(0) = 0 and zero weight rows/cols contribute nothing). The observation
    (K=size_ob) and action (N=size_action) dims keep their real, narrow sizes
    so the streamed input/output arrays stay small. Weights are cast to the
    streaming/compute dtype; biases stay f32 (added onto the f32 accumulator).
    """
    w1, b1 = raw["w1"], raw["b1"]
    w2, b2 = raw["w2"], raw["b2"]
    w3, b3 = raw["w3"], raw["b3"]
    size_ob, h1 = w1.shape
    _, h2 = w2.shape
    _, size_action = w3.shape
    H1 = _round_up(h1, 128)
    H2 = _round_up(h2, 128)

    w1p = jnp.zeros((size_ob, H1), jnp.float32).at[:, :h1].set(w1)
    b1p = jnp.zeros((1, H1), jnp.float32).at[:, :h1].set(b1.reshape(1, -1))
    w2p = jnp.zeros((H1, H2), jnp.float32).at[:h1, :h2].set(w2)
    b2p = jnp.zeros((1, H2), jnp.float32).at[:, :h2].set(b2.reshape(1, -1))
    w3p = jnp.zeros((H2, size_action), jnp.float32).at[:h2, :].set(w3)
    b3p = b3.reshape(1, -1).astype(jnp.float32)

    return {
        "w1": w1p.astype(compute_dtype), "b1": b1p,
        "w2": w2p.astype(compute_dtype), "b2": b2p,
        "w3": w3p.astype(compute_dtype), "b3": b3p,
    }


def ppo_actor_forward(ob, prepared, *, tb=2048):
    """ob: (B, size_ob) any float/int dtype. Returns (B, size_action) float32."""
    w1, b1 = prepared["w1"], prepared["b1"]
    w2, b2 = prepared["w2"], prepared["b2"]
    w3, b3 = prepared["w3"], prepared["b3"]
    cdt = w1.dtype

    B, size_ob = ob.shape
    assert size_ob == w1.shape[0]
    size_action = w3.shape[1]

    # Batch tiling:
    #   tiny batch          -> one small tile (rounded to sublane granularity)
    #   moderate batch      -> exactly 2 tiles (keeps both v7x TensorCores busy)
    #   large batch         -> tb-row tiles (amortizes ~0.35 us per grid step)
    B8 = _round_up(B, 8)
    if B8 <= 16:
        TB = B8
    elif B8 <= 2 * tb:
        TB = _round_up((B8 + 1) // 2, 8)
    else:
        TB = tb
    B_pad = _round_up(B8, TB)

    # Pad only the batch rows of the narrow (B, size_ob) observation stream.
    ob_c = ob.astype(cdt) if ob.dtype != cdt else ob
    if B_pad != B:
        ob_c = jnp.pad(ob_c, ((0, B_pad - B), (0, 0)))

    stream_spec = lambda n: pl.BlockSpec((TB, n), lambda i: (i, 0))
    const_spec = lambda a: pl.BlockSpec(a.shape, lambda i: (0, 0))   # resident in VMEM

    out = pl.pallas_call(
        _ppo_actor_kernel,
        out_shape=jax.ShapeDtypeStruct((B_pad, size_action), jnp.float32),
        grid=(B_pad // TB,),
        in_specs=[
            stream_spec(size_ob),
            const_spec(w1), const_spec(b1),
            const_spec(w2), const_spec(b2),
            const_spec(w3), const_spec(b3),
        ],
        out_specs=stream_spec(size_action),
        compiler_params=pltpu.CompilerParams(
            dimension_semantics=("parallel",),      # megacore on v7x
            vmem_limit_bytes=32 * 1024 * 1024,      # safe on v5e/v6e/v7x
        ),
    )(ob_c, w1, b1, w2, b2, w3, b3)

    return out if B_pad == B else out[:B]


def ppo_actor_ref(ob, raw):
    x = ob.astype(jnp.float32)
    hp = jax.lax.Precision.HIGHEST
    h1 = jnp.maximum(jnp.dot(x, raw["w1"], precision=hp) + raw["b1"], 0.0)
    h2 = jnp.maximum(jnp.dot(h1, raw["w2"], precision=hp) + raw["b2"], 0.0)
    logits = jnp.dot(h2, raw["w3"], precision=hp) + raw["b3"]
    return jax.nn.softmax(logits, axis=-1)


if __name__ == "__main__":
    key = jax.random.PRNGKey(0)
    k_ob, k_params, k_big = jax.random.split(key, 3)

    # Small shapes consistent with the module: batch=2, size_ob=8,
    # HIDDEN_SIZE_1=32, HIDDEN_SIZE_2=32, size_action=4.
    B, size_ob, H1, H2, size_action = 2, 8, 32, 32, 4

    raw = init_params(k_params, size_ob, H1, H2, size_action)
    ob = jax.random.normal(k_ob, (B, size_ob), dtype=jnp.float32)
    ref = ppo_actor_ref(ob, raw)

    # f32 path (matches the PyTorch module's numerics).
    prep32 = prepare_params(raw, jnp.float32)
    out32 = jax.block_until_ready(ppo_actor_forward(ob, prep32))
    assert out32.shape == (B, size_action)
    assert jnp.allclose(out32, ref, atol=2e-3, rtol=2e-3)
    assert jnp.allclose(jnp.sum(out32, axis=-1), 1.0, atol=1e-3)

    # bf16 streaming path (default): halves HBM traffic for ob / weights,
    # f32 MXU accumulation + f32 softmax.
    prep16 = prepare_params(raw)
    out16 = jax.block_until_ready(ppo_actor_forward(ob, prep16))
    assert out16.shape == (B, size_action)
    assert jnp.allclose(out16, ref, atol=5e-2, rtol=5e-2)
    assert jnp.allclose(jnp.sum(out16, axis=-1), 1.0, atol=2e-3)

    # Exercise the multi-tile batch grid (non-multiple batch, 2 grid steps).
    big_ob = jax.random.normal(k_big, (1029, size_ob), dtype=jnp.float32)
    big_out = jax.block_until_ready(ppo_actor_forward(big_ob, prep32))
    assert big_out.shape == (1029, size_action)
    assert jnp.allclose(big_out, ppo_actor_ref(big_ob, raw), atol=2e-3, rtol=2e-3)

    print("KERNEL_OK")
</pallas_src>

<mosaic_0001>
module attributes {stable_mosaic.version = 11 : i64} {
  func.func @_ppo_actor_kernel(%arg0: i32, %arg1: memref<8x8xf32, #tpu.memory_space<vmem>>, %arg2: memref<8x128xf32, #tpu.memory_space<vmem>>, %arg3: memref<1x128xf32, #tpu.memory_space<vmem>>, %arg4: memref<128x128xf32, #tpu.memory_space<vmem>>, %arg5: memref<1x128xf32, #tpu.memory_space<vmem>>, %arg6: memref<128x4xf32, #tpu.memory_space<vmem>>, %arg7: memref<1x4xf32, #tpu.memory_space<vmem>>, %arg8: memref<8x4xf32, #tpu.memory_space<vmem>>) attributes {dimension_semantics = [#tpu.dimension_semantics<parallel>], iteration_bounds = array<i64: 1>, scalar_prefetch = 0 : i64, scratch_operands = 0 : i64, tpu.core_type = #tpu.core_type<tc>, window_params = [{transform_indices = @transform_0, window_bounds = array<i64: 8, 8>}, {pipeline_mode = #tpu.pipeline_mode<synchronous>, transform_indices = @transform_1, window_bounds = array<i64: 8, 128>}, {pipeline_mode = #tpu.pipeline_mode<synchronous>, transform_indices = @transform_2, window_bounds = array<i64: 1, 128>}, {pipeline_mode = #tpu.pipeline_mode<synchronous>, transform_indices = @transform_3, window_bounds = array<i64: 128, 128>}, {pipeline_mode = #tpu.pipeline_mode<synchronous>, transform_indices = @transform_4, window_bounds = array<i64: 1, 128>}, {pipeline_mode = #tpu.pipeline_mode<synchronous>, transform_indices = @transform_5, window_bounds = array<i64: 128, 4>}, {pipeline_mode = #tpu.pipeline_mode<synchronous>, transform_indices = @transform_6, window_bounds = array<i64: 1, 4>}, {transform_indices = @transform_7, window_bounds = array<i64: 8, 4>}]} {
    %c0 = arith.constant 0 : index
    %c0_0 = arith.constant 0 : index
    %0 = vector.load %arg1[%c0, %c0_0] : memref<8x8xf32, #tpu.memory_space<vmem>>, vector<8x8xf32>
    %c0_1 = arith.constant 0 : index
    %c0_2 = arith.constant 0 : index
    %1 = vector.load %arg2[%c0_1, %c0_2] : memref<8x128xf32, #tpu.memory_space<vmem>>, vector<8x128xf32>
    %cst = arith.constant dense<0.000000e+00> : vector<8x128xf32>
    %2 = tpu.matmul %0, %1, %cst {dimension_numbers = #tpu.dot_dimension_numbers<[1], [0], [0], [1], [0, 0, 1, 1], [], []>} : vector<8x8xf32>, vector<8x128xf32>, vector<8x128xf32> -> vector<8x128xf32>
    %c0_3 = arith.constant 0 : index
    %c0_4 = arith.constant 0 : index
    %3 = vector.load %arg3[%c0_3, %c0_4] : memref<1x128xf32, #tpu.memory_space<vmem>>, vector<1x128xf32>
    %4 = vector.broadcast %3 : vector<1x128xf32> to vector<8x128xf32>
    %5 = arith.addf %2, %4 : vector<8x128xf32>
    %cst_5 = arith.constant 0.000000e+00 : f32
    %6 = vector.broadcast %cst_5 : f32 to vector<8x128xf32>
    %7 = arith.maximumf %5, %6 : vector<8x128xf32>
    %c0_6 = arith.constant 0 : index
    %c0_7 = arith.constant 0 : index
    %8 = vector.load %arg4[%c0_6, %c0_7] : memref<128x128xf32, #tpu.memory_space<vmem>>, vector<128x128xf32>
    %cst_8 = arith.constant dense<0.000000e+00> : vector<8x128xf32>
    %9 = tpu.matmul %7, %8, %cst_8 {dimension_numbers = #tpu.dot_dimension_numbers<[1], [0], [0], [1], [0, 0, 1, 1], [], []>} : vector<8x128xf32>, vector<128x128xf32>, vector<8x128xf32> -> vector<8x128xf32>
    %c0_9 = arith.constant 0 : index
    %c0_10 = arith.constant 0 : index
    %10 = vector.load %arg5[%c0_9, %c0_10] : memref<1x128xf32, #tpu.memory_space<vmem>>, vector<1x128xf32>
    %11 = vector.broadcast %10 : vector<1x128xf32> to vector<8x128xf32>
    %12 = arith.addf %9, %11 : vector<8x128xf32>
    %cst_11 = arith.constant 0.000000e+00 : f32
    %13 = vector.broadcast %cst_11 : f32 to vector<8x128xf32>
    %14 = arith.maximumf %12, %13 : vector<8x128xf32>
    %c0_12 = arith.constant 0 : index
    %c0_13 = arith.constant 0 : index
    %15 = vector.load %arg6[%c0_12, %c0_13] : memref<128x4xf32, #tpu.memory_space<vmem>>, vector<128x4xf32>
    %cst_14 = arith.constant dense<0.000000e+00> : vector<8x4xf32>
    %16 = tpu.matmul %14, %15, %cst_14 {dimension_numbers = #tpu.dot_dimension_numbers<[1], [0], [0], [1], [0, 0, 1, 1], [], []>} : vector<8x128xf32>, vector<128x4xf32>, vector<8x4xf32> -> vector<8x4xf32>
    %c0_15 = arith.constant 0 : index
    %c0_16 = arith.constant 0 : index
    %17 = vector.load %arg7[%c0_15, %c0_16] : memref<1x4xf32, #tpu.memory_space<vmem>>, vector<1x4xf32>
    %18 = vector.broadcast %17 : vector<1x4xf32> to vector<8x4xf32>
    %19 = arith.addf %16, %18 : vector<8x4xf32>
    %cst_17 = arith.constant dense<0xFF800000> : vector<8xf32>
    %20 = vector.multi_reduction <maximumf>, %19, %cst_17 [1] : vector<8x4xf32> to vector<8xf32>
    %21 = vector.shape_cast %20 : vector<8xf32> to vector<8x1xf32>
    %22 = vector.broadcast %21 : vector<8x1xf32> to vector<8x4xf32>
    %23 = arith.subf %19, %22 : vector<8x4xf32>
    %24 = math.exp %23 : vector<8x4xf32>
    %cst_18 = arith.constant dense<0.000000e+00> : vector<8xf32>
    %25 = vector.multi_reduction <add>, %24, %cst_18 [1] : vector<8x4xf32> to vector<8xf32>
    %26 = vector.shape_cast %25 : vector<8xf32> to vector<8x1xf32>
    %27 = vector.broadcast %26 : vector<8x1xf32> to vector<8x4xf32>
    %28 = arith.divf %24, %27 : vector<8x4xf32>
    %c0_19 = arith.constant 0 : index
    %c0_20 = arith.constant 0 : index
    %29 = vector.load %arg8[%c0_19, %c0_20] : memref<8x4xf32, #tpu.memory_space<vmem>>, vector<8x4xf32>
    tpu.vector_store %arg8[%c0_19, %c0_20], %28 {strides = array<i32>} : memref<8x4xf32, #tpu.memory_space<vmem>>, vector<8x4xf32>,
    return
  }
  func.func @transform_0(%arg0: i32) -> (i32, i32) {
    %c0_i32 = arith.constant 0 : i32
    %c0_i32_0 = arith.constant 0 : i32
    return %arg0, %c0_i32 : i32, i32
  }
  func.func @transform_1(%arg0: i32) -> (i32, i32) {
    %c0_i32 = arith.constant 0 : i32
    %c0_i32_0 = arith.constant 0 : i32
    %c0_i32_1 = arith.constant 0 : i32
    return %c0_i32, %c0_i32_0 : i32, i32
  }
  func.func @transform_2(%arg0: i32) -> (i32, i32) {
    %c0_i32 = arith.constant 0 : i32
    %c0_i32_0 = arith.constant 0 : i32
    %c0_i32_1 = arith.constant 0 : i32
    return %c0_i32, %c0_i32_0 : i32, i32
  }
  func.func @transform_3(%arg0: i32) -> (i32, i32) {
    %c0_i32 = arith.constant 0 : i32
    %c0_i32_0 = arith.constant 0 : i32
    %c0_i32_1 = arith.constant 0 : i32
    return %c0_i32, %c0_i32_0 : i32, i32
  }
  func.func @transform_4(%arg0: i32) -> (i32, i32) {
    %c0_i32 = arith.constant 0 : i32
    %c0_i32_0 = arith.constant 0 : i32
    %c0_i32_1 = arith.constant 0 : i32
    return %c0_i32, %c0_i32_0 : i32, i32
  }
  func.func @transform_5(%arg0: i32) -> (i32, i32) {
    %c0_i32 = arith.constant 0 : i32
    %c0_i32_0 = arith.constant 0 : i32
    %c0_i32_1 = arith.constant 0 : i32
    return %c0_i32, %c0_i32_0 : i32, i32
  }
  func.func @transform_6(%arg0: i32) -> (i32, i32) {
    %c0_i32 = arith.constant 0 : i32
    %c0_i32_0 = arith.constant 0 : i32
    %c0_i32_1 = arith.constant 0 : i32
    return %c0_i32, %c0_i32_0 : i32, i32
  }
  func.func @transform_7(%arg0: i32) -> (i32, i32) {
    %c0_i32 = arith.constant 0 : i32
    %c0_i32_0 = arith.constant 0 : i32
    return %arg0, %c0_i32 : i32, i32
  }
}

</mosaic_0001>

<bundles_post_ra>
// kernel: tpu_custom_call.1
= control target key start
LH: loop header
LB: loop body
LE: loop exit
PB: predicated region body
PF: predicated region fallthrough
CT: control target
= control target key end

     0   :  { %12 = vsyncpa [#allocation3], 0  ;;  %s419_s0 = inlined_call_operand.hbm [shape: f32[8,8], index: 0, kind: input, shape index: {}]   ;;  %s420_s1 = inlined_call_operand.hbm [shape: f32[8,128], index: 1, kind: input, shape index: {}]   ;;  %s421_s2 = inlined_call_operand.vmem [shape: f32[1,128], index: 2, kind: input, shape index: {}]   ;;  %s422_s3 = inlined_call_operand.vmem [shape: f32[128,128], index: 3, kind: input, shape index: {}]   ;;  %s423_s4 = inlined_call_operand.vmem [shape: f32[1,128], index: 4, kind: input, shape index: {}]   ;;  %s424_s5 = inlined_call_operand.vmem [shape: f32[128,4], index: 5, kind: input, shape index: {}]   ;;  %s425_s6 = inlined_call_operand.vmem [shape: f32[1,4], index: 6, kind: input, shape index: {}]   ;;  %s426_s7 = inlined_call_operand.vmem [shape: f32[8,4], index: 7, kind: output, shape index: {}]  }
   0x1   :  { %s19_s26 = sshll.u32 %s419_s0, 4  ;;  %s20_s26 = int_to_ptr.hbm [resolvable:$true] %s19_s26 }
   0x2   :  { %13 = vsyncpa [#allocation5], 0  ;;  %s260_s27 = smov [#allocation2]   ;;  %s30_s8 = sshll.u32 %s420_s1, 4  ;;  %s31_s8 = int_to_ptr.hbm [resolvable:$true] %s30_s8 }
   0x3   :  { %s21_s28 = sshll.u32 %s260_s27, 4  ;;  %s261_s9 = smov [#allocation4]   ;;  %s22_s28 = int_to_ptr.vmem [resolvable:$true] %s21_s28 }
   0x4   :  { %24 = dma.hbm_to_vmem [thread:$0]  %s20_s26, 128, %s22_s28, [#allocation3]  }
   0x5   :  { %s32_s10 = sshll.u32 %s261_s9, 4  ;;  %s33_s10 = int_to_ptr.vmem [resolvable:$true] %s32_s10 }
   0x6   :  { %35 = dma.hbm_to_vmem [thread:$0]  %s31_s8, 128, %s33_s10, [#allocation5]  }
   0x7   :  { %256 = dma.done.wait [#allocation3], 128  }
   0x8   :  { %257 = vsyncadd [#allocation3], 4294967168 }
   0x9   :  { %258 = dma.done.wait [#allocation5], 128  }
   0xa   :  { %259 = vsyncadd [#allocation5], 4294967168  ;;  %vm60_vm0 = vcmask 64512   ;;  %v55_v0 = vld [vmem:[#allocation4] sm:$0xff]  ;;  %v54_v1 = vld [vmem:[#allocation2] sm:$0xff]  ;;  %vm166_vm1 = vcmask 31744  }
   0xb   :  { %v100_v2 = vld [vmem:[%s422_s3 + $0x78] sm:$0xff]  ;;  %79 = vmatpush.msra.mxu0 %v55_v0  ;;  %v99_v3 = vld [vmem:[%s422_s3 + $0x70] sm:$0xff]  ;;  %v98_v4 = vld [vmem:[%s422_s3 + $0x68] sm:$0xff] }
   0xc   :  { %105 = vmatpush.msra.mxu1 %v100_v2  ;;  %198 = vmatmul.msk.f32.vlgmr.msra.gmra.mxu0 %vm60_vm0, %v54_v1  ;;  %v97_v5 = vld [vmem:[%s422_s3 + $0x60] sm:$0xff]  ;;  %v96_v6 = vld [vmem:[%s422_s3 + $0x58] sm:$0xff]  ;;  %v95_v7 = vld [vmem:[%s422_s3 + $0x50] sm:$0xff] }
   0xd   :  { %v94_v8 = vld [vmem:[%s422_s3 + $0x48] sm:$0xff]  ;;  %v93_v9 = vld [vmem:[%s422_s3 + $0x40] sm:$0xff]  ;;  %v92_v10 = vld [vmem:[%s422_s3 + $0x38] sm:$0xff] }
   0xe   :  { %106 = vmatpush.msra.mxu1 %v99_v3  ;;  %v91_v11 = vld [vmem:[%s422_s3 + $0x30] sm:$0xff]  ;;  %v90_v12 = vld [vmem:[%s422_s3 + $0x28] sm:$0xff]  ;;  %v89_v13 = vld [vmem:[%s422_s3 + $0x20] sm:$0xff] }
   0xf   :  { %v88_v14 = vld [vmem:[%s422_s3 + $0x18] sm:$0xff]  ;;  %v87_v15 = vld [vmem:[%s422_s3 + $0x10] sm:$0xff]  ;;  %v86_v16 = vld [vmem:[%s422_s3 + $0x8] sm:$0xff] }
  0x10   :  { %107 = vmatpush.msra.mxu1 %v98_v4  ;;  %v85_v17 = vld [vmem:[%s422_s3] sm:$0xff]  ;;  %v141_v18 = vld [vmem:[%s424_s5 + $0x78] sm:$0xff]  ;;  %v140_v19 = vld [vmem:[%s424_s5 + $0x70] sm:$0xff] }
  0x11   :  { %146 = vmatpush.msra.mxu2 %v141_v18  ;;  %v139_v20 = vld [vmem:[%s424_s5 + $0x68] sm:$0xff]  ;;  %v138_v21 = vld [vmem:[%s424_s5 + $0x60] sm:$0xff]  ;;  %v137_v22 = vld [vmem:[%s424_s5 + $0x58] sm:$0xff] }
  0x12   :  { %108 = vmatpush.msra.mxu1 %v97_v5  ;;  %v136_v23 = vld [vmem:[%s424_s5 + $0x50] sm:$0xff]  ;;  %v135_v24 = vld [vmem:[%s424_s5 + $0x48] sm:$0xff]  ;;  %v134_v25 = vld [vmem:[%s424_s5 + $0x40] sm:$0xff] }
  0x13   :  { %147 = vmatpush.msra.mxu2 %v140_v19  ;;  %v133_v26 = vld [vmem:[%s424_s5 + $0x38] sm:$0xff]  ;;  %v132_v27 = vld [vmem:[%s424_s5 + $0x30] sm:$0xff]  ;;  %v131_v28 = vld [vmem:[%s424_s5 + $0x28] sm:$0xff] }
  0x14   :  { %109 = vmatpush.msra.mxu1 %v96_v6  ;;  %v130_v29 = vld [vmem:[%s424_s5 + $0x20] sm:$0xff]  ;;  %v129_v30 = vld [vmem:[%s424_s5 + $0x18] sm:$0xff]  ;;  %v128_v35 = vld [vmem:[%s424_s5 + $0x10] sm:$0xff] }
  0x15   :  { %148 = vmatpush.msra.mxu2 %v139_v20  ;;  %v201_v31 = vld [vmem:[%s421_s2] ss:$0 sm:$0xff]  ;;  %v127_v36 = vld [vmem:[%s424_s5 + $0x8] sm:$0xff] }
  0x16   :  { %110 = vmatpush.msra.mxu1 %v95_v7  ;;  %v126_v37 = vld [vmem:[%s424_s5] sm:$0xff] }
  0x17   :  { %149 = vmatpush.msra.mxu2 %v138_v21  ;;  %v202_v38 = vld [vmem:[%s423_s4] ss:$0 sm:$0xff] }
  0x18   :  { %111 = vmatpush.msra.mxu1 %v94_v8  ;;  %v203_v42 = vld [vmem:[%s425_s6] ss:$0 sm:$0xff] }
  0x19   :  { %150 = vmatpush.msra.mxu2 %v137_v22 }
  0x1a   :  { %112 = vmatpush.msra.mxu1 %v93_v9 }
  0x1b   :  { %151 = vmatpush.msra.mxu2 %v136_v23 }
  0x1c   :  { %113 = vmatpush.msra.mxu1 %v92_v10 }
  0x1d   :  { %152 = vmatpush.msra.mxu2 %v135_v24 }
  0x1e   :  { %114 = vmatpush.msra.mxu1 %v91_v11 }
  0x1f   :  { %153 = vmatpush.msra.mxu2 %v134_v25 }
  0x20   :  { %115 = vmatpush.msra.mxu1 %v90_v12 }
  0x21   :  { %154 = vmatpush.msra.mxu2 %v133_v26 }
  0x22   :  { %116 = vmatpush.msra.mxu1 %v89_v13 }
  0x23   :  { %155 = vmatpush.msra.mxu2 %v132_v27 }
  0x24   :  { %117 = vmatpush.msra.mxu1 %v88_v14 }
  0x25   :  { %156 = vmatpush.msra.mxu2 %v131_v28 }
  0x26   :  { %118 = vmatpush.msra.mxu1 %v87_v15 }
  0x27   :  { %157 = vmatpush.msra.mxu2 %v130_v29 }
  0x28   :  { %119 = vmatpush.msra.mxu1 %v86_v16 }
  0x29   :  { %158 = vmatpush.msra.mxu2 %v129_v30 }
  0x2a   :  { %120 = vmatpush.msra.mxu1 %v85_v17 }
  0x2b   :  { %159 = vmatpush.msra.mxu2 %v128_v35 }
  0x2d   :  { %160 = vmatpush.msra.mxu2 %v127_v36 }
  0x2f   :  { %161 = vmatpush.msra.mxu2 %v126_v37 }
  0x89   :  { %v81_v32 = vpop.f32.mrf.mxu0 }
  0x8a   :  { %v82_v33 = vadd.f32 %v201_v31, %v81_v32 }
  0x8c   :  { %v84_v34 = vmax.f32 %v82_v33, 0.0 }
  0x8e   :  { %121 = vmatmul.f32.vlgmr.msra.gmra.mxu1 %v84_v34 }
 0x10b   :  { %v122_v39 = vpop.f32.mrf.mxu1 }
 0x10c   :  { %v123_v40 = vadd.f32 %v202_v38, %v122_v39 }
 0x10e   :  { %v125_v41 = vmax.f32 %v123_v40, 0.0 }
 0x110   :  { %162 = vmatmul.f32.vlgmr.msra.gmra.mxu2 %v125_v41 }
 0x193   :  { %v163_v43 = vpop.f32.mrf.mxu2 }
 0x194   :  { %v164_v44 = vadd.f32 %v203_v42, %v163_v43 }
 0x196   :  { %v167_v45 = vsel %vm166_vm1, %v164_v44, -inf }
 0x197   :  { %168 = vmax.xlane.f32.xlu0 %v167_v45 }
 0x20a   :  { %v169_v46 = vpop.xlane.xlu0 %168 }
 0x20b   :  { %v170_v47 = vsub.f32 %v164_v44, %v169_v46 }
 0x20d   :  { %v171_v48 = vmul.f32 1.442695, %v170_v47 }
 0x20f   :  { %204 = vpow2.f32 %v171_v48 }
 0x215   :  { %v205_v49 = vpop.eup %204 }
 0x216   :  { %v173_v50 = vsel %vm166_vm1, %v205_v49, 0.0 }
 0x217   :  { %174 = vadd.xlane.f32.xlu0 %v173_v50 }
 0x28a   :  { %v175_v51 = vpop.xlane.xlu0 %174 }
 0x28b   :  { %206 = vrcp.f32 %v175_v51  ;;  %v187_v55 = vand.u32 2147483648, %v175_v51  ;;  %v185_v57 = vand.u32 2147483647, %v175_v51  ;;  %vm181_vm3 = vweird.f32 %v175_v51 }
 0x28d   :  { %v188_v59 = vor.u32 1.1754944e-38, %v187_v55  ;;  %vm186_vm5 = vcmp.eq.f32.partialorder %v185_v57, 8.507059e+37 }
 0x291   :  { %v207_v52 = vpop.eup %206 }
 0x292   :  { %v177_v53 = vmul.f32 %v207_v52, %v175_v51  ;;  %vm182_vm2 = vweird.f32 %v207_v52 }
 0x293   :  { %vm183_vm4 = vmor %vm181_vm3, %vm182_vm2 }
 0x294   :  { %v178_v54 = vsub.f32 1.0, %v177_v53 }
 0x296   :  { %v179_v56 = vmul.f32 %v207_v52, %v178_v54 }
 0x298   :  { %v180_v58 = vadd.f32 %v207_v52, %v179_v56 }
 0x29a   :  { %v184_v60 = vsel %vm183_vm4, %v207_v52, %v180_v58 }
 0x29b   :  { %v189_v61 = vsel %vm186_vm5, %v188_v59, %v184_v60 }
 0x29c   :  { %v190_v62 = vmul.f32 %v205_v49, %v189_v61 }
 0x29e   :  { %191 = vst.msk [vmem:[%s426_s7] sm:$0xff] %vm166_vm1, %v190_v62 }
 0x29f   :  { %196 = vsyncpa [#allocation3], 1 }
 0x2a0   :  { %197 = vsyncpa [#allocation5], 1 }

</bundles_post_ra>
